<compile_context>
chip_gen: v7x
topology: tpu7x:2x2x1
jax: 0.10.0
libtpu: 0.0.40
codegen_flags: <defaults>
</compile_context>

<pallas_src>
import jax
import jax.numpy as jnp
from jax import lax
from jax.experimental import pallas as pl
from jax.experimental.pallas import tpu as pltpu

NEG_SLOPE = 0.01   # nn.LeakyReLU() default
BN_EPS = 1e-5      # nn.BatchNorm2d default eps

# TODO(synk): the eval-time `pooling_size is not None` path (avg_pool2d +
# replicate pad) of ASPP._global_pooling is not implemented; this kernel covers
# the default pooling_size=None / training-style global-average-pool path.


def _leaky(x):
    return jnp.where(x > 0, x, NEG_SLOPE * x)


def _round_up(x, m):
    return ((x + m - 1) // m) * m


def _pad_axis(a, axis, new_size):
    pad = [(0, 0)] * a.ndim
    pad[axis] = (0, new_size - a.shape[axis])
    return jnp.pad(a, pad)


def _pick_row_tile(h, w, max_pixels=1024):
    """Largest divisor of h whose tile holds <= max_pixels pixels."""
    # TODO(synk): for awkward H, switch to pl.cdiv grid + masked tail tiles
    # instead of shrinking the tile to a divisor of H.
    best = 1
    for th in range(1, h + 1):
        if h % th == 0 and th * w <= max_pixels:
            best = th
    return best


# ----------------------------- Pallas kernels ------------------------------

def _make_main_kernel(n_views, th, w, dmax, dils, cin, hid_p, cout_p):
    """Main ASPP kernel: 1x1 + three dilated 3x3 branches -> map_bn -> leaky
    -> fused red_conv -> + pooled branch -> red_bn -> leaky, one row tile per
    grid step.  The dilated taps are sliced out of `n_views` shingled row-tile
    views of the zero-padded bf16 input (views[k] = padded rows
    [(r+k)*th, (r+k+1)*th))."""
    tr = th * w

    def kernel(*refs):
        views = refs[:n_views]
        (pool_ref, w0_ref, w1_ref, w2_ref, w3_ref,
         bns_ref, bnb_ref, wr_ref, rbns_ref, rbnb_ref,
         o_ref, yall_ref) = refs[n_views:]

        def tap(row_off, col_off):
            # rows [row_off, row_off+th), cols [col_off, col_off+w) of the
            # conceptual (n_views*th, w+2*dmax, cin) halo.  All offsets are
            # static -> emitted as static slices of the view refs.
            chunks = []
            row, remaining = row_off, th
            while remaining > 0:
                v, o = row // th, row % th
                take = min(th - o, remaining)
                chunks.append(views[v][0, o:o + take, col_off:col_off + w, :])
                row += take
                remaining -= take
            xt = chunks[0] if len(chunks) == 1 else jnp.concatenate(chunks, axis=0)
            return xt.reshape(tr, cin)                 # bf16 (TR, Cin)

        def bn_leaky(y, bi):
            s = bns_ref[0, bi * hid_p:(bi + 1) * hid_p]
            b = bnb_ref[0, bi * hid_p:(bi + 1) * hid_p]
            return _leaky(y * s + b)                   # f32 epilogue

        # ---- branch 0: 1x1 conv ----
        y0 = jnp.dot(tap(dmax, dmax), w0_ref[...],
                     preferred_element_type=jnp.float32)
        yall_ref[:, 0:hid_p] = bn_leaky(y0, 0).astype(yall_ref.dtype)

        # ---- dilated 3x3 branches (9 accumulating matmuls each) ----
        for bi, (w_ref, d) in enumerate(zip((w1_ref, w2_ref, w3_ref), dils), 1):
            acc = jnp.zeros((tr, hid_p), jnp.float32)
            for ky in range(3):
                for kx in range(3):
                    acc = acc + jnp.dot(
                        tap(dmax + (ky - 1) * d, dmax + (kx - 1) * d),
                        w_ref[3 * ky + kx],
                        preferred_element_type=jnp.float32)
            yall_ref[:, bi * hid_p:(bi + 1) * hid_p] = (
                bn_leaky(acc, bi).astype(yall_ref.dtype))

        # ---- fused red_conv (single K = 4*hid_p matmul) + pool + red_bn ----
        out = jnp.dot(yall_ref[...], wr_ref[...],
                      preferred_element_type=jnp.float32)
        out = out + pool_ref[0, 0]                     # broadcast pooled branch
        out = _leaky(out * rbns_ref[0] + rbnb_ref[0])
        o_ref[0] = out.astype(o_ref.dtype)

    return kernel


def pool_branch_kernel(xm_ref, wgp_ref, gs_ref, gb_ref, wpr_ref, o_ref):
    """Global-pool branch on precomputed per-image channel means:
    1x1 conv -> BN -> leaky -> 1x1 conv (all tiny, f32)."""
    y = jnp.dot(xm_ref[...], wgp_ref[...], preferred_element_type=jnp.float32)
    y = _leaky(y * gs_ref[0] + gb_ref[0])
    z = jnp.dot(y, wpr_ref[...], preferred_element_type=jnp.float32)
    o_ref[...] = z[:, None, :]


# ------------------------------ forward wrapper ------------------------------

def aspp_forward(x_nchw, p, out_channels, dilations=(12, 24, 36)):
    n, cin, h, w = x_nchw.shape
    dmax = max(dilations)
    hid_p = p['w0'].shape[1]
    cout_p = p['wr'].shape[1]

    x = jnp.transpose(x_nchw, (0, 2, 3, 1))                     # NHWC, f32

    # ---- global pooling branch: mean in XLA, tiny Pallas kernel on (N, Cin) --
    xm = jnp.mean(x, axis=(1, 2))                               # (N, Cin)
    pool = pl.pallas_call(
        pool_branch_kernel,
        out_shape=jax.ShapeDtypeStruct((n, 1, cout_p), jnp.float32),
    )(xm, p['wgp'], p['gbn_s'], p['gbn_b'], p['wpr'])

    # ---- main branches ----
    th = _pick_row_tile(h, w)               # image rows per tile (divides h)
    r_tiles = h // th
    tr = th * w                             # pixels per tile (lane-dense rows)
    n_views = 1 + pl.cdiv(2 * dmax, th)     # shingled halo views per tile
    wp = w + 2 * dmax
    hp = (r_tiles + n_views - 1) * th       # padded rows, multiple of th

    # single zero-padded bf16 copy of the input (replaces the 27x im2col)
    xpad = jnp.pad(x, ((0, 0), (dmax, hp - h - dmax), (dmax, dmax), (0, 0)))
    xpad = xpad.astype(jnp.bfloat16)

    view_specs = [
        pl.BlockSpec((1, th, wp, cin), (lambda b, r, k=k: (b, r + k, 0, 0)))
        for k in range(n_views)
    ]

    def full_spec(a):
        nd = a.ndim
        return pl.BlockSpec(a.shape, lambda b, r, nd=nd: (0,) * nd)

    kernel = _make_main_kernel(n_views, th, w, dmax, tuple(dilations),
                               cin, hid_p, cout_p)

    out = pl.pallas_call(
        kernel,
        out_shape=jax.ShapeDtypeStruct((n, h * w, cout_p), jnp.float32),
        grid_spec=pltpu.PrefetchScalarGridSpec(
            num_scalar_prefetch=0,
            grid=(n, r_tiles),
            in_specs=view_specs + [
                pl.BlockSpec((1, 1, cout_p), lambda b, r: (b, 0, 0)),
                full_spec(p['w0']), full_spec(p['w1']),
                full_spec(p['w2']), full_spec(p['w3']),
                full_spec(p['bn_s']), full_spec(p['bn_b']),
                full_spec(p['wr']),
                full_spec(p['rbn_s']), full_spec(p['rbn_b']),
            ],
            out_specs=pl.BlockSpec((1, tr, cout_p), lambda b, r: (b, r, 0)),
            scratch_shapes=[pltpu.VMEM((tr, 4 * hid_p), jnp.bfloat16)],
        ),
        compiler_params=pltpu.CompilerParams(
            dimension_semantics=("parallel", "arbitrary"),
            vmem_limit_bytes=64 * 1024 * 1024),
    )(*([xpad] * n_views), pool,
      p['w0'], p['w1'], p['w2'], p['w3'],
      p['bn_s'], p['bn_b'], p['wr'], p['rbn_s'], p['rbn_b'])

    out = out.reshape(n, h, w, cout_p)[:, :, :, :out_channels]  # strip lane pad
    return jnp.transpose(out, (0, 3, 1, 2))                     # back to NCHW


# ----------------------- deterministic parameter init -----------------------

def init_params(key, in_channels, out_channels, hidden):
    ks = jax.random.split(key, 10)

    def wgt(k, shape, scale=0.1):
        return scale * jax.random.normal(k, shape, jnp.float32)

    def bn(k, c):
        k1, k2, k3, k4 = jax.random.split(k, 4)
        gamma = 1.0 + 0.1 * jax.random.normal(k1, (c,), jnp.float32)
        beta = 0.1 * jax.random.normal(k2, (c,), jnp.float32)
        mean = 0.1 * jax.random.normal(k3, (c,), jnp.float32)
        var = 0.5 + jax.random.uniform(k4, (c,), jnp.float32)
        scale = gamma / jnp.sqrt(var + BN_EPS)
        return scale, beta - mean * scale

    raw = dict(
        conv0=wgt(ks[0], (hidden, in_channels, 1, 1)),
        conv1=wgt(ks[1], (hidden, in_channels, 3, 3)),
        conv2=wgt(ks[2], (hidden, in_channels, 3, 3)),
        conv3=wgt(ks[3], (hidden, in_channels, 3, 3)),
        gp=wgt(ks[4], (hidden, in_channels, 1, 1)),
        red=wgt(ks[5], (out_channels, 4 * hidden, 1, 1)),
        pr=wgt(ks[6], (out_channels, hidden, 1, 1)),
    )
    raw['bn_s'], raw['bn_b'] = bn(ks[7], 4 * hidden)
    raw['gbn_s'], raw['gbn_b'] = bn(ks[8], hidden)
    raw['rbn_s'], raw['rbn_b'] = bn(ks[9], out_channels)
    return raw


def kernel_params(raw, in_channels, out_channels, hidden):
    """Repack PyTorch-layout weights for the kernels: matmul layout, hid/Cout
    zero-padded to multiples of 128 lanes, matmul weights in bf16."""
    hid_p = _round_up(hidden, 128)
    cout_p = _round_up(out_channels, 128)

    def conv1x1(wr):            # (out, in, 1, 1) -> (in, out)
        return wr[:, :, 0, 0].T

    def conv3x3(wr):            # (out, in, 3, 3) -> (9, in, out), tap-major
        return jnp.transpose(wr, (2, 3, 1, 0)).reshape(9, in_channels, hidden)

    w0 = _pad_axis(conv1x1(raw['conv0']), 1, hid_p).astype(jnp.bfloat16)
    w1 = _pad_axis(conv3x3(raw['conv1']), 2, hid_p).astype(jnp.bfloat16)
    w2 = _pad_axis(conv3x3(raw['conv2']), 2, hid_p).astype(jnp.bfloat16)
    w3 = _pad_axis(conv3x3(raw['conv3']), 2, hid_p).astype(jnp.bfloat16)

    bn_s = _pad_axis(raw['bn_s'].reshape(4, hidden), 1, hid_p).reshape(1, 4 * hid_p)
    bn_b = _pad_axis(raw['bn_b'].reshape(4, hidden), 1, hid_p).reshape(1, 4 * hid_p)

    wr = conv1x1(raw['red']).reshape(4, hidden, out_channels)
    wr = _pad_axis(_pad_axis(wr, 1, hid_p), 2, cout_p)
    wr = wr.reshape(4 * hid_p, cout_p).astype(jnp.bfloat16)

    rbn_s = _pad_axis(raw['rbn_s'][None, :], 1, cout_p)
    rbn_b = _pad_axis(raw['rbn_b'][None, :], 1, cout_p)

    # pooled branch stays tiny f32
    wgp = _pad_axis(conv1x1(raw['gp']), 1, hid_p)
    gbn_s = _pad_axis(raw['gbn_s'][None, :], 1, hid_p)
    gbn_b = _pad_axis(raw['gbn_b'][None, :], 1, hid_p)
    wpr = _pad_axis(_pad_axis(conv1x1(raw['pr']), 0, hid_p), 1, cout_p)

    return dict(w0=w0, w1=w1, w2=w2, w3=w3, wr=wr,
                bn_s=bn_s, bn_b=bn_b, rbn_s=rbn_s, rbn_b=rbn_b,
                wgp=wgp, gbn_s=gbn_s, gbn_b=gbn_b, wpr=wpr)


# ------------------------------ pure-JAX reference ---------------------------

def aspp_reference(x, raw, dilations):
    dn = ('NCHW', 'OIHW', 'NCHW')
    ys = [lax.conv_general_dilated(x, raw['conv0'], (1, 1), 'VALID',
                                   dimension_numbers=dn)]
    for wkey, d in zip(('conv1', 'conv2', 'conv3'), dilations):
        ys.append(lax.conv_general_dilated(
            x, raw[wkey], (1, 1), ((d, d), (d, d)),
            rhs_dilation=(d, d), dimension_numbers=dn))
    out = jnp.concatenate(ys, axis=1)
    out = _leaky(out * raw['bn_s'][None, :, None, None]
                 + raw['bn_b'][None, :, None, None])
    out = lax.conv_general_dilated(out, raw['red'], (1, 1), 'VALID',
                                   dimension_numbers=dn)
    pool = x.mean(axis=(2, 3), keepdims=True)
    pool = lax.conv_general_dilated(pool, raw['gp'], (1, 1), 'VALID',
                                    dimension_numbers=dn)
    pool = _leaky(pool * raw['gbn_s'][None, :, None, None]
                  + raw['gbn_b'][None, :, None, None])
    pool = lax.conv_general_dilated(pool, raw['pr'], (1, 1), 'VALID',
                                    dimension_numbers=dn)
    out = out + pool                                     # pool.repeat(1,1,H,W)
    out = _leaky(out * raw['rbn_s'][None, :, None, None]
                 + raw['rbn_b'][None, :, None, None])
    return out


# ------------------------------------ main -----------------------------------

if __name__ == "__main__":
    N, Cin, H, W = 2, 8, 16, 16
    hidden, Cout = 32, 16
    dil = (12, 24, 36)

    key = jax.random.PRNGKey(0)
    kx, kp = jax.random.split(key)
    x = jax.random.normal(kx, (N, Cin, H, W), jnp.float32)

    raw = init_params(kp, Cin, Cout, hidden)
    p = kernel_params(raw, Cin, Cout, hidden)

    out = aspp_forward(x, p, Cout, dilations=dil)
    out = jax.block_until_ready(out)

    ref = aspp_reference(x, raw, dil)
    assert out.shape == (N, Cout, H, W), out.shape
    err = float(jnp.max(jnp.abs(out - ref)))
    denom = float(jnp.max(jnp.abs(ref))) + 1e-6
    assert err / denom < 3e-2, (err, denom)

    print("KERNEL_OK")
</pallas_src>

<mosaic_0001>
module attributes {stable_mosaic.version = 11 : i64} {
  func.func @pool_branch_kernel(%arg0: memref<2x8xf32, #tpu.memory_space<vmem>>, %arg1: memref<8x128xf32, #tpu.memory_space<vmem>>, %arg2: memref<1x128xf32, #tpu.memory_space<vmem>>, %arg3: memref<1x128xf32, #tpu.memory_space<vmem>>, %arg4: memref<128x128xf32, #tpu.memory_space<vmem>>, %arg5: memref<2x1x128xf32, #tpu.memory_space<vmem>>) attributes {dimension_semantics = [], scalar_prefetch = 0 : i64, scratch_operands = 0 : i64, tpu.core_type = #tpu.core_type<tc>} {
    %c0 = arith.constant 0 : index
    %c0_0 = arith.constant 0 : index
    %0 = vector.load %arg0[%c0, %c0_0] : memref<2x8xf32, #tpu.memory_space<vmem>>, vector<2x8xf32>
    %c0_1 = arith.constant 0 : index
    %c0_2 = arith.constant 0 : index
    %1 = vector.load %arg1[%c0_1, %c0_2] : memref<8x128xf32, #tpu.memory_space<vmem>>, vector<8x128xf32>
    %cst = arith.constant dense<0.000000e+00> : vector<2x128xf32>
    %2 = tpu.matmul %0, %1, %cst {dimension_numbers = #tpu.dot_dimension_numbers<[1], [0], [0], [1], [0, 0, 1, 1], [], []>} : vector<2x8xf32>, vector<8x128xf32>, vector<2x128xf32> -> vector<2x128xf32>
    %c0_3 = arith.constant 0 : index
    %c0_4 = arith.constant 0 : index
    %3 = vector.load %arg2[%c0_3, %c0_4] : memref<1x128xf32, #tpu.memory_space<vmem>>, vector<1x128xf32>
    %4 = vector.shape_cast %3 : vector<1x128xf32> to vector<128xf32>
    %5 = vector.shape_cast %4 : vector<128xf32> to vector<1x128xf32>
    %6 = vector.broadcast %5 : vector<1x128xf32> to vector<2x128xf32>
    %7 = arith.mulf %2, %6 : vector<2x128xf32>
    %c0_5 = arith.constant 0 : index
    %c0_6 = arith.constant 0 : index
    %8 = vector.load %arg3[%c0_5, %c0_6] : memref<1x128xf32, #tpu.memory_space<vmem>>, vector<1x128xf32>
    %9 = vector.shape_cast %8 : vector<1x128xf32> to vector<128xf32>
    %10 = vector.shape_cast %9 : vector<128xf32> to vector<1x128xf32>
    %11 = vector.broadcast %10 : vector<1x128xf32> to vector<2x128xf32>
    %12 = arith.addf %7, %11 : vector<2x128xf32>
    %cst_7 = arith.constant 0.000000e+00 : f32
    %13 = vector.broadcast %cst_7 : f32 to vector<2x128xf32>
    %14 = arith.cmpf ogt, %12, %13 : vector<2x128xf32>
    %cst_8 = arith.constant 0.00999999977 : f32
    %15 = vector.broadcast %cst_8 : f32 to vector<2x128xf32>
    %16 = arith.mulf %15, %12 : vector<2x128xf32>
    %17 = arith.select %14, %12, %16 : vector<2x128xi1>, vector<2x128xf32>
    %c0_9 = arith.constant 0 : index
    %c0_10 = arith.constant 0 : index
    %18 = vector.load %arg4[%c0_9, %c0_10] : memref<128x128xf32, #tpu.memory_space<vmem>>, vector<128x128xf32>
    %cst_11 = arith.constant dense<0.000000e+00> : vector<2x128xf32>
    %19 = tpu.matmul %17, %18, %cst_11 {dimension_numbers = #tpu.dot_dimension_numbers<[1], [0], [0], [1], [0, 0, 1, 1], [], []>} : vector<2x128xf32>, vector<128x128xf32>, vector<2x128xf32> -> vector<2x128xf32>
    %20 = vector.shape_cast %19 : vector<2x128xf32> to vector<2x1x128xf32>
    %c0_12 = arith.constant 0 : index
    %c0_13 = arith.constant 0 : index
    %c0_14 = arith.constant 0 : index
    %21 = vector.load %arg5[%c0_12, %c0_13, %c0_14] : memref<2x1x128xf32, #tpu.memory_space<vmem>>, vector<2x1x128xf32>
    tpu.vector_store %arg5[%c0_12, %c0_13, %c0_14], %20 {strides = array<i32>} : memref<2x1x128xf32, #tpu.memory_space<vmem>>, vector<2x1x128xf32>,
    return
  }
}

</mosaic_0001>

<bundles_post_ra>
// kernel: tpu_custom_call.1
= control target key start
LH: loop header
LB: loop body
LE: loop exit
PB: predicated region body
PF: predicated region fallthrough
CT: control target
= control target key end

     0   :  { %10 = vsyncpa [#allocation3], 0  ;;  %s574_s0 = inlined_call_operand.hbm [shape: f32[2,8], index: 0, kind: input, shape index: {}]   ;;  %s575_s1 = inlined_call_operand.hbm [shape: f32[8,128], index: 1, kind: input, shape index: {}]   ;;  %s576_s2 = inlined_call_operand.vmem [shape: f32[1,128], index: 2, kind: input, shape index: {}]   ;;  %s577_s3 = inlined_call_operand.vmem [shape: f32[1,128], index: 3, kind: input, shape index: {}]   ;;  %s578_s4 = inlined_call_operand.hbm [shape: f32[128,128], index: 4, kind: input, shape index: {}]   ;;  %s579_s5 = inlined_call_operand.hbm [shape: f32[2,1,128], index: 5, kind: output, shape index: {}]  }
   0x1   :  { %11 = vsyncpa [#allocation6], 0 }
   0x2   :  { %12 = vsyncpa [#allocation4], 0  ;;  %s478_s18 = smov [#allocation5]   ;;  %s479_s20 = smov [#allocation2]  }
   0x3   :  { %s29_s19 = sshll.u32 %s478_s18, 4  ;;  %s19_s21 = sshll.u32 %s479_s20, 4  ;;  %s30_s19 = int_to_ptr.vmem [resolvable:$true] %s29_s19  ;;  %s20_s21 = int_to_ptr.vmem [resolvable:$true] %s19_s21 }
   0x4   :  { %s384_s24 = scalar_lea.hbm %s575_s1, 128 }
   0x5   :  { %p385_p0 = scmp.ne.s32.totalorder %s575_s1, %s384_s24  ;;  %p388_p1 = scmp.lt.u32.totalorder %s384_s24, %s575_s1 }
   0x7   :  { %p390_p2 = pnand %p388_p1, %p385_p0 }
   0x9   :  { %393 = shalt.err (!%p390_p2)
}
   0xa   :  { %s394_s29 = scalar_lea.vmem %s30_s19, 128  ;;  %p399_p4 = scmp.lt.s32.totalorder %s30_s19, %s30_s19 }
   0xb   :  { %p395_p3 = scmp.ne.s32.totalorder %s30_s19, %s394_s29  ;;  %p400_p5 = scmp.lt.s32.totalorder %s394_s29, %s394_s29 }
   0xd   :  { %p401_p6 = por %p400_p5, %p399_p4 }
   0xf   :  { %p402_p7 = pnand %p401_p6, %p395_p3 }
  0x11   :  { %405 = shalt.err (!%p402_p7)
}
  0x12   :  { %32 = dma.hbm_to_vmem [thread:$0]  %s575_s1, 128, %s30_s19, [#allocation6]  }
  0x13   :  { %s406_s9 = scalar_lea.hbm %s574_s0, 32 }
  0x14   :  { %p407_p8 = scmp.ne.s32.totalorder %s574_s0, %s406_s9  ;;  %p410_p9 = scmp.lt.u32.totalorder %s406_s9, %s574_s0 }
  0x16   :  { %p412_p10 = pnand %p410_p9, %p407_p8 }
  0x18   :  { %415 = shalt.err (!%p412_p10)
}
  0x19   :  { %s416_s14 = scalar_lea.vmem %s20_s21, 32  ;;  %p421_p12 = scmp.lt.s32.totalorder %s20_s21, %s20_s21 }
  0x1a   :  { %p417_p11 = scmp.ne.s32.totalorder %s20_s21, %s416_s14  ;;  %p422_p13 = scmp.lt.s32.totalorder %s416_s14, %s416_s14 }
  0x1c   :  { %p423_p0 = por %p422_p13, %p421_p12 }
  0x1e   :  { %p424_p1 = pnand %p423_p0, %p417_p11 }
  0x20   :  { %427 = shalt.err (!%p424_p1)
}
  0x21   :  { %22 = dma.hbm_to_vmem [thread:$0]  %s574_s0, 32, %s20_s21, [#allocation3]  }
  0x22   :  { %s480_s16 = smov [#allocation7]   ;;  %s428_s20 = scalar_lea.hbm %s578_s4, 2048 }
  0x23   :  { %s42_s17 = sshll.u32 %s480_s16, 4  ;;  %p429_p2 = scmp.ne.s32.totalorder %s578_s4, %s428_s20  ;;  %s43_s17 = int_to_ptr.vmem [resolvable:$true] %s42_s17 }
  0x24   :  { %p432_p3 = scmp.lt.u32.totalorder %s428_s20, %s578_s4 }
  0x26   :  { %p434_p4 = pnand %p432_p3, %p429_p2 }
  0x28   :  { %437 = shalt.err (!%p434_p4)
}
  0x29   :  { %s438_s26 = scalar_lea.vmem %s43_s17, 2048  ;;  %p443_p6 = scmp.lt.s32.totalorder %s43_s17, %s43_s17 }
  0x2a   :  { %p439_p5 = scmp.ne.s32.totalorder %s43_s17, %s438_s26  ;;  %p444_p7 = scmp.lt.s32.totalorder %s438_s26, %s438_s26 }
  0x2c   :  { %p445_p8 = por %p444_p7, %p443_p6 }
  0x2e   :  { %p446_p9 = pnand %p445_p8, %p439_p5 }
  0x30   :  { %449 = shalt.err (!%p446_p9)
}
  0x31   :  { %s481_s0 = smov 128   ;;  %s482_s21 = smov 8  }
  0x32   :  { %48 = dma.hbm_to_vmem [thread:$0]  %s578_s4, 2048, %s43_s17, [#allocation6], %s481_s0, %s481_s0, %s482_s21  }
  0x33   :  { %472 = dma.done.wait [#allocation3], 32  }
  0x34   :  { %473 = vsyncadd [#allocation3], 4294967264 }
  0x35   :  { %474 = dma.done.wait [#allocation6], 2176  }
  0x36   :  { %475 = vsyncadd [#allocation6], 4294965120  ;;  %v483_v0 = vmov 0.0   ;;  %vm484_vm0 = vmmov 0   ;;  %v485_v1 = vmov 0.0|0.0   ;;  %vm60_vm1 = vcmask 64512  }
  0x37   :  { %308 = vmatprep.subr.mxu0 %v483_v0  ;;  %310 = vmatprep.mubr.msk.f32.mxu0 %vm484_vm0, %v483_v0  ;;  %v59_v2 = vld [vmem:[#allocation5] sm:$0xff]  ;;  %v58_v3 = vld [vmem:[#allocation2] sm:$0x3]  ;;  %v153_v4 = vld [vmem:[#allocation7] sm:$0xff]  ;;  %v486_v36 = vmov 1966171168   ;;  %v243_v38 = vlaneseq }
  0x38   :  { %348 = vmatprep.subr.bf16.mxu1 %v485_v1  ;;  %345 = vmatprep.mubr.msk.f32.mxu1 %vm484_vm0, %v483_v0  ;;  %v154_v5 = vld [vmem:[#allocation7 + $0x8] sm:$0xff]  ;;  %v155_v6 = vld [vmem:[#allocation7 + $0x10] sm:$0xff]  ;;  %v156_v7 = vld [vmem:[#allocation7 + $0x18] sm:$0xff]  ;;  %v241_v37 = vunpack.c.l.s4 %v486_v36  ;;  %s487_s7 = smov [#allocation8]  }
  0x39   :  { %309 = vmatpush3.msra.mxu0 %v59_v2  ;;  %v349_v8 = vpack.c.bf16 %v154_v5, %v153_v4  ;;  %v352_v9 = vpack.c.bf16 %v156_v7, %v155_v6  ;;  %v157_v10 = vld [vmem:[#allocation7 + $0x20] sm:$0xff]  ;;  %v158_v11 = vld [vmem:[#allocation7 + $0x28] sm:$0xff]  ;;  %v159_v13 = vld [vmem:[#allocation7 + $0x30] sm:$0xff]  ;;  %v244_v40 = vshrl.u32 %v243_v38, 7 }
  0x3a   :  { %311 = vmatmul.mubr.msk.f32.vlgmr.msra.gmra.mrb[0].mxu0 %vm60_vm1, %v58_v3  ;;  %v355_v12 = vpack.c.bf16 %v158_v11, %v157_v10  ;;  %v160_v14 = vld [vmem:[#allocation7 + $0x38] sm:$0xff]  ;;  %v161_v16 = vld [vmem:[#allocation7 + $0x40] sm:$0xff]  ;;  %v162_v17 = vld [vmem:[#allocation7 + $0x48] sm:$0xff]  ;;  %v242_v39 = vunpack.c.0.s8 %v241_v37 }
  0x3b   :  { %350 = vmatpush3.bf16.msra.mxu1 %v349_v8  ;;  %v358_v15 = vpack.c.bf16 %v160_v14, %v159_v13  ;;  %v361_v18 = vpack.c.bf16 %v162_v17, %v161_v16  ;;  %v163_v19 = vld [vmem:[#allocation7 + $0x50] sm:$0xff]  ;;  %v164_v20 = vld [vmem:[#allocation7 + $0x58] sm:$0xff]  ;;  %v165_v22 = vld [vmem:[#allocation7 + $0x60] sm:$0xff] }
  0x3c   :  { %351 = vmatprep.subr.bf16.mxu1 %v485_v1  ;;  %v364_v21 = vpack.c.bf16 %v164_v20, %v163_v19  ;;  %v166_v23 = vld [vmem:[#allocation7 + $0x68] sm:$0xff]  ;;  %v167_v25 = vld [vmem:[#allocation7 + $0x70] sm:$0xff]  ;;  %v168_v26 = vld [vmem:[#allocation7 + $0x78] sm:$0xff]  ;;  %v245_v41 = vsub.s32 %v242_v39, %v244_v40 }
  0x3d   :  { %v367_v24 = vpack.c.bf16 %v166_v23, %v165_v22  ;;  %v370_v27 = vpack.c.bf16 %v168_v26, %v167_v25  ;;  %v285_v28 = vld [vmem:[%s576_s2] ss:$0 sm:$0xff]  ;;  %s271_s2 = sshll.u32 %s487_s7, 4  ;;  %s272_s2 = int_to_ptr.vmem [resolvable:$true] %s271_s2 }
  0x3e   :  { %v286_v30 = vld [vmem:[%s577_s3] ss:$0 sm:$0xff]  ;;  %s450_s3 = scalar_lea.vmem %s272_s2, 32  ;;  %p455_p11 = scmp.lt.s32.totalorder %s272_s2, %s272_s2 }
  0x3f   :  { %353 = vmatpush3.bf16.msra.mxu1 %v352_v9  ;;  %p451_p10 = scmp.ne.s32.totalorder %s272_s2, %s450_s3  ;;  %p456_p12 = scmp.lt.s32.totalorder %s450_s3, %s450_s3 }
  0x40   :  { %354 = vmatprep.subr.bf16.mxu1 %v485_v1 }
  0x41   :  { %p457_p13 = por %p456_p12, %p455_p11 }
  0x43   :  { %356 = vmatpush3.bf16.msra.mxu1 %v355_v12  ;;  %p458_p0 = pnand %p457_p13, %p451_p10 }
  0x44   :  { %357 = vmatprep.subr.bf16.mxu1 %v485_v1 }
  0x47   :  { %359 = vmatpush3.bf16.msra.mxu1 %v358_v15 }
  0x48   :  { %360 = vmatprep.subr.bf16.mxu1 %v485_v1 }
  0x4b   :  { %362 = vmatpush3.bf16.msra.mxu1 %v361_v18 }
  0x4c   :  { %363 = vmatprep.subr.bf16.mxu1 %v485_v1 }
  0x4f   :  { %365 = vmatpush3.bf16.msra.mxu1 %v364_v21 }
  0x50   :  { %366 = vmatprep.subr.bf16.mxu1 %v485_v1 }
  0x53   :  { %368 = vmatpush3.bf16.msra.mxu1 %v367_v24 }
  0x54   :  { %369 = vmatprep.subr.bf16.mxu1 %v485_v1 }
  0x57   :  { %371 = vmatpush3.bf16.msra.mxu1 %v370_v27 }
 0x10d   :  { %v130_v29 = vpop.f32.mrb[0].mxu0 }
 0x10e   :  { %v141_v31 = vmul.f32 %v285_v28, %v130_v29  ;;  %v312_v32 = vpop.f32.mrb[1].mxu0 }
 0x110   :  { %v149_v33 = vadd.f32 %v286_v30, %v141_v31 }
 0x112   :  { %vm150_vm2 = vcmp.gt.f32.partialorder %v149_v33, 0.0  ;;  %v151_v34 = vmul.f32 0.01, %v149_v33 }
 0x114   :  { %v152_v35 = vsel %vm150_vm2, %v149_v33, %v151_v34 }
 0x115   :  { %346 = vmatmul.mubr.f32.vlgmr.msra.gmra.mrb[0].mxu1 %v152_v35 }
 0x1e8   :  { %v235_v42 = vpop.f32.mrb[0].mxu1 }
 0x1e9   :  { %v246_v43 = vrot.slane %v235_v42, %v245_v41  ;;  %v347_v44 = vpop.f32.mrb[1].mxu1 }
 0x1eb   :  { %v247_v45 = vcombine.high %v246_v43, %v246_v43  ;;  %287 = vst.sshfl [vmem:[#allocation8] sm:$0x1 pattern:$0x73625140] %v246_v43 }
 0x1ed   :  { %288 = vst.sshfl [vmem:[#allocation8 + $0x1] sm:$0x1 pattern:$0x73625140] %v247_v45 }
 0x1ee   :  { %461 = shalt.err (!%p458_p0)
}
 0x1ef   :  { %s462_s10 = scalar_lea.hbm %s579_s5, 32 }
 0x1f0   :  { %p463_p1 = scmp.ne.s32.totalorder %s579_s5, %s462_s10  ;;  %p466_p2 = scmp.lt.u32.totalorder %s462_s10, %s579_s5 }
 0x1f2   :  { %p468_p3 = pnand %p466_p2, %p463_p1 }
 0x1f4   :  { %471 = shalt.err (!%p468_p3)
}
 0x1f5   :  { %s488_s1 = smov 16   ;;  %s489_s15 = smov 1  }
 0x1f6   :  { %277 = dma.vmem_to_hbm [thread:$0]  %s272_s2, 32, %s579_s5, [#allocation4], %s488_s1, %s488_s1, %s489_s15  }
 0x1f7   :  { %476 = dma.done.wait [#allocation4], 32  }
 0x1f8   :  { %477 = vsyncadd [#allocation4], 4294967264 }
 0x1f9   :  { %281 = vsyncpa [#allocation3], 1 }
 0x1fa   :  { %282 = vsyncpa [#allocation6], 1 }
 0x1fb   :  { %283 = vsyncpa [#allocation4], 1 }

</bundles_post_ra>
